<compile_context>
chip_gen: v6e
topology: v6e:2x2x1
jax: 0.10.0
libtpu: 0.0.40
codegen_flags: <defaults>
</compile_context>

<pallas_src>
import functools

import jax
import jax.numpy as jnp
from jax import lax
from jax.experimental import pallas as pl
from jax.experimental.pallas import tpu as pltpu


def _round_up(x, m):
    return (x + m - 1) // m * m


def _mention_extractor_kernel(feats_ref, w_ref, b_ref, scores_ref, tags_ref, *,
                              t_real):
    x = feats_ref[...]                      # [tile_n, H]     f32 (pipelined)
    w = w_ref[...]                          # [H, T_pad]      f32 (VMEM-resident)
    b = b_ref[...]                          # [1, T_pad]      f32 (VMEM-resident)

    # Linear + ReLU (MLP forward, dropout_rate=0.0 -> identity).
    s = jnp.dot(x, w, preferred_element_type=jnp.float32) + b
    s = jnp.maximum(s, 0.0)                 # pad cols have w=0, b=0 -> exactly 0

    # First-max argmax over the real tag columns only (2 cross-lane
    # reductions; pad mask folded into the where).  Pads are 0 and real
    # columns are >= 0 after ReLU, so the max is always hit on a real column.
    t_pad = s.shape[-1]
    ids = lax.broadcasted_iota(jnp.int32, s.shape, 1)
    valid = ids < t_real
    mx = jnp.max(s, axis=-1, keepdims=True)
    idx = jnp.min(jnp.where((s == mx) & valid, ids, t_pad),
                  axis=-1, keepdims=True)   # [tile_n, 1] int32

    scores_ref[...] = s[:, :t_real].astype(scores_ref.dtype)   # [tile_n, T]
    tags_ref[...] = idx                                         # [tile_n, 1]


def prepare_params(weight, bias, lane_multiple=128):
    """One-time layout prep (hoisted out of the per-call forward path).

    weight: [T, H] (torch nn.Linear layout), bias: [T].
    Returns (w_pad [H, T_pad], b_pad [1, T_pad], t_real) with the tag dim of
    the weights padded to a multiple of 128 lanes (zeros) for full-vreg MXU /
    argmax work inside the kernel.
    """
    t, h = weight.shape
    t_pad = _round_up(max(t, 1), lane_multiple)
    w_pad = jnp.zeros((h, t_pad), weight.dtype).at[:, :t].set(weight.T)
    b_pad = jnp.zeros((1, t_pad), bias.dtype).at[0, :t].set(bias)
    return w_pad, b_pad, t


def mention_extractor_forward(feats, w_pad, b_pad, t_real, *, tile_n=512):
    """feats: [N, H] f32; (w_pad, b_pad, t_real) from prepare_params()."""
    n, h = feats.shape
    t_pad = w_pad.shape[1]

    # Tile the token dim; pad N so the grid divides evenly.
    tile_n = min(tile_n, _round_up(n, 8))
    n_pad = _round_up(n, tile_n)
    if n_pad != n:
        feats = jnp.pad(feats, ((0, n_pad - n), (0, 0)))

    grid = (n_pad // tile_n,)

    elt = 4
    vmem_need = (2 * tile_n * h * elt                  # feats double buffer
                 + 2 * tile_n * t_pad * elt            # in-kernel scores temp
                 + 2 * tile_n * (t_real + 1) * elt     # output double buffers
                 + 2 * (h * t_pad + t_pad) * elt)      # resident weight + bias
    vmem_limit = int(min(max(vmem_need + (4 << 20), 16 << 20), 64 << 20))

    scores, tags = pl.pallas_call(
        functools.partial(_mention_extractor_kernel, t_real=t_real),
        out_shape=(
            jax.ShapeDtypeStruct((n_pad, t_real), jnp.float32),
            jax.ShapeDtypeStruct((n_pad, 1), jnp.int32),
        ),
        grid=grid,
        in_specs=[
            pl.BlockSpec((tile_n, h), lambda i: (i, 0)),    # feats tile (pipelined)
            pl.BlockSpec((h, t_pad), lambda i: (0, 0)),     # weight (stays resident)
            pl.BlockSpec((1, t_pad), lambda i: (0, 0)),     # bias   (stays resident)
        ],
        out_specs=(
            pl.BlockSpec((tile_n, t_real), lambda i: (i, 0)),
            pl.BlockSpec((tile_n, 1), lambda i: (i, 0)),
        ),
        compiler_params=pltpu.CompilerParams(
            dimension_semantics=("parallel",),
            vmem_limit_bytes=vmem_limit,
        ),
        cost_estimate=pl.CostEstimate(
            flops=2 * n_pad * h * t_pad,
            transcendentals=0,
            bytes_accessed=(n_pad * h + h * t_pad + t_pad
                            + n_pad * t_real + n_pad) * elt,
        ),
    )(feats, w_pad, b_pad)

    if n_pad != n:
        scores = scores[:n]
        tags = tags[:n]
    return scores, tags[:, 0]


if __name__ == "__main__":
    # Small shapes consistent with the module: seq=8 tokens, hidden=32,
    # tagset = {O, B, I, PAD} -> 4 tags.
    N, H, T = 8, 32, 4

    key = jax.random.PRNGKey(0)
    k_feats, k_w, k_b = jax.random.split(key, 3)
    feats = jax.random.normal(k_feats, (N, H), dtype=jnp.float32)
    # Deterministic "Linear" params (torch layout: weight [T, H], bias [T]).
    weight = jax.random.normal(k_w, (T, H), dtype=jnp.float32) * 0.1
    bias = jax.random.normal(k_b, (T,), dtype=jnp.float32) * 0.1

    # One-time parameter layout prep (hoisted out of the forward path).
    w_pad, b_pad, t_real = prepare_params(weight, bias)

    scores, tags = mention_extractor_forward(feats, w_pad, b_pad, t_real)
    jax.block_until_ready((scores, tags))

    # Reference check against plain JAX.
    ref_scores = jnp.maximum(feats @ weight.T + bias, 0.0)
    ref_tags = jnp.argmax(ref_scores, axis=-1).astype(jnp.int32)
    assert scores.shape == (N, T) and tags.shape == (N,)
    assert jnp.allclose(scores, ref_scores, atol=1e-5), "scores mismatch"
    assert jnp.array_equal(tags, ref_tags), "tags mismatch"

    print("KERNEL_OK")
</pallas_src>

<mosaic_0001>
module attributes {stable_mosaic.version = 11 : i64} {
  func.func @_mention_extractor_kernel(%arg0: i32, %arg1: memref<8x32xf32, #tpu.memory_space<vmem>>, %arg2: memref<32x128xf32, #tpu.memory_space<vmem>>, %arg3: memref<1x128xf32, #tpu.memory_space<vmem>>, %arg4: memref<8x4xf32, #tpu.memory_space<vmem>>, %arg5: memref<8x1xi32, #tpu.memory_space<vmem>>) attributes {dimension_semantics = [#tpu.dimension_semantics<parallel>], iteration_bounds = array<i64: 1>, scalar_prefetch = 0 : i64, scratch_operands = 0 : i64, tpu.core_type = #tpu.core_type<tc>, window_params = [{transform_indices = @transform_0, window_bounds = array<i64: 8, 32>}, {pipeline_mode = #tpu.pipeline_mode<synchronous>, transform_indices = @transform_1, window_bounds = array<i64: 32, 128>}, {pipeline_mode = #tpu.pipeline_mode<synchronous>, transform_indices = @transform_2, window_bounds = array<i64: 1, 128>}, {transform_indices = @transform_3, window_bounds = array<i64: 8, 4>}, {transform_indices = @transform_4, window_bounds = array<i64: 8, 1>}]} {
    %c0 = arith.constant 0 : index
    %c0_0 = arith.constant 0 : index
    %0 = vector.load %arg1[%c0, %c0_0] : memref<8x32xf32, #tpu.memory_space<vmem>>, vector<8x32xf32>
    %c0_1 = arith.constant 0 : index
    %c0_2 = arith.constant 0 : index
    %1 = vector.load %arg2[%c0_1, %c0_2] : memref<32x128xf32, #tpu.memory_space<vmem>>, vector<32x128xf32>
    %c0_3 = arith.constant 0 : index
    %c0_4 = arith.constant 0 : index
    %2 = vector.load %arg3[%c0_3, %c0_4] : memref<1x128xf32, #tpu.memory_space<vmem>>, vector<1x128xf32>
    %cst = arith.constant dense<0.000000e+00> : vector<8x128xf32>
    %3 = tpu.matmul %0, %1, %cst {dimension_numbers = #tpu.dot_dimension_numbers<[1], [0], [0], [1], [0, 0, 1, 1], [], []>} : vector<8x32xf32>, vector<32x128xf32>, vector<8x128xf32> -> vector<8x128xf32>
    %4 = vector.broadcast %2 : vector<1x128xf32> to vector<8x128xf32>
    %5 = arith.addf %3, %4 : vector<8x128xf32>
    %cst_5 = arith.constant 0.000000e+00 : f32
    %6 = vector.broadcast %cst_5 : f32 to vector<8x128xf32>
    %7 = arith.maximumf %5, %6 : vector<8x128xf32>
    %8 = tpu.iota {dimensions = array<i32: 1>} : vector<8x128xi32>
    %c4_i32 = arith.constant 4 : i32
    %9 = vector.broadcast %c4_i32 : i32 to vector<8x128xi32>
    %10 = arith.cmpi slt, %8, %9 : vector<8x128xi32>
    %cst_6 = arith.constant dense<0xFF800000> : vector<8xf32>
    %11 = vector.multi_reduction <maximumf>, %7, %cst_6 [1] : vector<8x128xf32> to vector<8xf32>
    %12 = vector.shape_cast %11 : vector<8xf32> to vector<8x1xf32>
    %13 = vector.broadcast %12 : vector<8x1xf32> to vector<8x128xf32>
    %14 = arith.cmpf oeq, %7, %13 : vector<8x128xf32>
    %15 = arith.andi %14, %10 : vector<8x128xi1>
    %c128_i32 = arith.constant 128 : i32
    %16 = vector.broadcast %c128_i32 : i32 to vector<8x128xi32>
    %17 = arith.select %15, %8, %16 : vector<8x128xi1>, vector<8x128xi32>
    %cst_7 = arith.constant dense<2147483647> : vector<8xi32>
    %18 = vector.multi_reduction <minsi>, %17, %cst_7 [1] : vector<8x128xi32> to vector<8xi32>
    %19 = vector.shape_cast %18 : vector<8xi32> to vector<8x1xi32>
    %20 = vector.extract_strided_slice %7 {offsets = [0, 0], sizes = [8, 4], strides = [1, 1]} : vector<8x128xf32> to vector<8x4xf32>
    %c0_8 = arith.constant 0 : index
    %c0_9 = arith.constant 0 : index
    %21 = vector.load %arg4[%c0_8, %c0_9] : memref<8x4xf32, #tpu.memory_space<vmem>>, vector<8x4xf32>
    tpu.vector_store %arg4[%c0_8, %c0_9], %20 {strides = array<i32>} : memref<8x4xf32, #tpu.memory_space<vmem>>, vector<8x4xf32>,
    %c0_10 = arith.constant 0 : index
    %c0_11 = arith.constant 0 : index
    %22 = vector.load %arg5[%c0_10, %c0_11] : memref<8x1xi32, #tpu.memory_space<vmem>>, vector<8x1xi32>
    tpu.vector_store %arg5[%c0_10, %c0_11], %19 {strides = array<i32>} : memref<8x1xi32, #tpu.memory_space<vmem>>, vector<8x1xi32>,
    return
  }
  func.func @transform_0(%arg0: i32) -> (i32, i32) {
    %c0_i32 = arith.constant 0 : i32
    %c0_i32_0 = arith.constant 0 : i32
    return %arg0, %c0_i32 : i32, i32
  }
  func.func @transform_1(%arg0: i32) -> (i32, i32) {
    %c0_i32 = arith.constant 0 : i32
    %c0_i32_0 = arith.constant 0 : i32
    %c0_i32_1 = arith.constant 0 : i32
    return %c0_i32, %c0_i32_0 : i32, i32
  }
  func.func @transform_2(%arg0: i32) -> (i32, i32) {
    %c0_i32 = arith.constant 0 : i32
    %c0_i32_0 = arith.constant 0 : i32
    %c0_i32_1 = arith.constant 0 : i32
    return %c0_i32, %c0_i32_0 : i32, i32
  }
  func.func @transform_3(%arg0: i32) -> (i32, i32) {
    %c0_i32 = arith.constant 0 : i32
    %c0_i32_0 = arith.constant 0 : i32
    return %arg0, %c0_i32 : i32, i32
  }
  func.func @transform_4(%arg0: i32) -> (i32, i32) {
    %c0_i32 = arith.constant 0 : i32
    %c0_i32_0 = arith.constant 0 : i32
    return %arg0, %c0_i32 : i32, i32
  }
}

</mosaic_0001>

<bundles_post_ra>
// kernel: tpu_custom_call.1
= control target key start
LH: loop header
LB: loop body
LE: loop exit
PB: predicated region body
PF: predicated region fallthrough
CT: control target
= control target key end

     0   :  { %10 = vsyncpa [#allocation3], 0  ;;  %s279_s0 = inlined_call_operand.hbm [shape: f32[8,32], index: 0, kind: input, shape index: {}]   ;;  %s280_s1 = inlined_call_operand.hbm [shape: f32[32,128], index: 1, kind: input, shape index: {}]   ;;  %s281_s2 = inlined_call_operand.vmem [shape: f32[1,128], index: 2, kind: input, shape index: {}]   ;;  %s282_s3 = inlined_call_operand.vmem [shape: f32[8,4], index: 3, kind: output, shape index: {0}]   ;;  %s283_s4 = inlined_call_operand.vmem [shape: s32[8,1], index: 4, kind: output, shape index: {1}]  }
   0x1   :  { %11 = vsyncpa [#allocation5], 0  ;;  %s233_s15 = smov [#allocation2]   ;;  %s234_s17 = smov [#allocation4]  }
   0x2   :  { %s18_s16 = sshll.u32 %s233_s15, 4  ;;  %s27_s18 = sshll.u32 %s234_s17, 4  ;;  %s19_s16 = int_to_ptr.vmem [resolvable:$true] %s18_s16  ;;  %s28_s18 = int_to_ptr.vmem [resolvable:$true] %s27_s18 }
   0x3   :  { %s197_s19 = scalar_lea.vmem %s19_s16, 128  ;;  %p202_p1 = scmp.lt.s32.totalorder %s19_s16, %s19_s16 }
   0x4   :  { %p198_p0 = scmp.ne.s32.totalorder %s19_s16, %s197_s19  ;;  %p203_p2 = scmp.lt.s32.totalorder %s197_s19, %s197_s19 }
   0x6   :  { %p204_p3 = por %p203_p2, %p202_p1 }
   0x8   :  { %p205_p4 = pnand %p204_p3, %p198_p0 }
   0xa   :  { %208 = shalt.err (!%p205_p4)
}
   0xb   :  { %21 = dma.hbm_to_vmem [thread:$0]  %s279_s0, 128, %s19_s16, [#allocation3]  }
   0xc   :  { %s217_s22 = scalar_lea.vmem %s28_s18, 512  ;;  %p222_p6 = scmp.lt.s32.totalorder %s28_s18, %s28_s18 }
   0xd   :  { %p218_p5 = scmp.ne.s32.totalorder %s28_s18, %s217_s22  ;;  %p223_p7 = scmp.lt.s32.totalorder %s217_s22, %s217_s22 }
   0xf   :  { %p224_p8 = por %p223_p7, %p222_p6 }
  0x11   :  { %p225_p9 = pnand %p224_p8, %p218_p5 }
  0x13   :  { %228 = shalt.err (!%p225_p9)
}
  0x14   :  { %s235_s23 = smov 128   ;;  %s236_s24 = smov 8  }
  0x15   :  { %33 = dma.hbm_to_vmem [thread:$0]  %s280_s1, 512, %s28_s18, [#allocation5], %s235_s23, %s235_s23, %s236_s24  }
  0x16   :  { %229 = dma.done.wait [#allocation3], 128  }
  0x17   :  { %230 = vsyncadd [#allocation3], 4294967168 }
  0x18   :  { %231 = dma.done.wait [#allocation5], 512  }
  0x19   :  { %232 = vsyncadd [#allocation5], 4294966784  ;;  %v237_v0 = vmov 0.0   ;;  %vm238_vm0 = vmmov 0   ;;  %v46_v1 = vld [vmem:[#allocation4 + $0x18] sm:$0xff]  ;;  %v45_v2 = vld [vmem:[#allocation4 + $0x10] sm:$0xff]  ;;  %v129_v11 = vlaneseq }
  0x1a   :  { %172 = vmatprep.subr.mxu0 %v237_v0  ;;  %180 = vmatprep.mubr.msk.f32.mxu0 %vm238_vm0, %v237_v0  ;;  %v44_v3 = vld [vmem:[#allocation4 + $0x8] sm:$0xff]  ;;  %v43_v4 = vld [vmem:[#allocation4] sm:$0xff]  ;;  %v42_v5 = vld [vmem:[#allocation2] sm:$0xff]  ;;  %vm54_vm1 = vcmask 261120   ;;  %vm151_vm2 = vcmask 31744   ;;  %vm153_vm7 = vcmask 7168  }
  0x1b   :  { %173 = vmatpush3.msra.mxu0 %v46_v1  ;;  %v165_v6 = vld [vmem:[%s281_s2] ss:$0 sm:$0xff]  ;;  %v130_v12 = vand.u32 127, %v129_v11 }
  0x1c   :  { %174 = vmatprep.subr.mxu0 %v237_v0 }
  0x1d   :  { %175 = vmatpush3.msra.mxu0 %v45_v2  ;;  %vm131_vm3 = vcmp.lt.s32.totalorder %v130_v12, 4 }
  0x1e   :  { %176 = vmatprep.subr.mxu0 %v237_v0 }
  0x1f   :  { %177 = vmatpush3.msra.mxu0 %v44_v3 }
  0x20   :  { %178 = vmatprep.subr.mxu0 %v237_v0 }
  0x21   :  { %179 = vmatpush3.msra.mxu0 %v43_v4 }
  0x22   :  { %181 = vmatmul.mubr.msk.f32.vlgmr.msra.gmra.mxu0 %vm54_vm1, %v42_v5 }
  0xe2   :  { %v124_v7 = vpop.f32.mrf.mxu0 }
  0xe3   :  { %v125_v8 = vadd.f32 %v165_v6, %v124_v7 }
  0xe4   :  { %v182_v9 = vpop.f32.mrf.mxu0 }
  0xe5   :  { %v128_v10 = vmax.f32 %v125_v8, 0.0 }
  0xe7   :  { %152 = vst.msk [vmem:[%s282_s3] sm:$0xff] %vm151_vm2, %v128_v10  ;;  %132 = vmax.xlane.f32.xlu0 %v128_v10 }
 0x170   :  { %v133_v13 = vpop.xlane.xlu0 %132 }
 0x171   :  { %vm134_vm4 = vcmp.eq.f32.partialorder %v128_v10, %v133_v13 }
 0x172   :  { %vm135_vm5 = vmand %vm134_vm4, %vm131_vm3 }
 0x173   :  { %v136_v14 = vsel %vm135_vm5, %v130_v12, 128 }
 0x174   :  { %v138_v15 = vshra.s32 %v136_v14, 16  ;;  %v137_v17 = vand.u32 65535, %v136_v14 }
 0x176   :  { %v140_v16 = vcvt.s32.f32 %v138_v15  ;;  %v139_v19 = vcvt.s32.f32 %v137_v17 }
 0x178   :  { %141 = vmin.xlane.f32.xlu0 %v140_v16 }
 0x201   :  { %v142_v18 = vpop.xlane.xlu0 %141 }
 0x202   :  { %vm143_vm6 = vcmp.eq.f32.partialorder %v140_v16, %v142_v18  ;;  %v148_v21 = vcvt.f32.s32 %v142_v18 }
 0x203   :  { %v144_v20 = vsel %vm143_vm6, %v139_v19, inf }
 0x204   :  { %145 = vmin.xlane.f32.xlu1 %v144_v20  ;;  %v149_v23 = vshll.u32 %v148_v21, 16 }
 0x28d   :  { %v146_v22 = vpop.xlane.xlu1 %145 }
 0x28e   :  { %v147_v24 = vcvt.f32.s32 %v146_v22 }
 0x290   :  { %v150_v25 = vadd.s32 %v149_v23, %v147_v24 }
 0x292   :  { %154 = vst.msk [vmem:[%s283_s4] sm:$0xff] %vm153_vm7, %v150_v25 }
 0x293   :  { %163 = vsyncpa [#allocation3], 1 }
 0x294   :  { %164 = vsyncpa [#allocation5], 1 }

</bundles_post_ra>
